<compile_context>
chip_gen: v7x
topology: tpu7x:2x2x1
jax: 0.10.0
libtpu: 0.0.40
codegen_flags: <defaults>
</compile_context>

<pallas_src>
import math

import jax
import jax.numpy as jnp
from jax.experimental import pallas as pl
from jax.experimental.pallas import tpu as pltpu


# Per-call VMEM budget for the double-buffered row tiles.  Conservative enough
# for every generation (v7x: 64 MiB physical; v5e scoped default is raised via
# vmem_limit_bytes) while large enough to run near HBM roofline.
_VMEM_TILE_BUDGET = 24 << 20


def _sublane_multiple(dtype) -> int:
    # Native sublane packing: 8 rows for 32-bit, 16 for 16-bit, 32 for 8-bit.
    itemsize = jnp.dtype(dtype).itemsize
    return 8 * max(1, 4 // itemsize)


def _pick_block_rows(M, C, dtype, n_tiled, param_bytes, requested):
    """Pick a sublane-aligned row-tile size that fits the VMEM budget."""
    itemsize = jnp.dtype(dtype).itemsize
    sub = _sublane_multiple(dtype)
    # Double-buffered tiles for every tiled input plus the output.
    per_row_bytes = 2 * (n_tiled + 1) * C * itemsize
    budget = _VMEM_TILE_BUDGET - 2 * param_bytes
    cap = max(sub, budget // per_row_bytes)
    tm = requested if requested is not None else 1024
    tm = min(tm, cap)
    if tm >= M:
        return M  # single full-extent tile (always a legal block shape)
    return max(sub, (tm // sub) * sub)


def _call_rowwise(kernel, tiled_arrays, whole_arrays, block_rows,
                  flops=None, input_output_aliases=None):
    """Run `kernel` over row tiles of `tiled_arrays` (all shaped (..., C),
    identically), passing `whole_arrays` untiled (resident) to every grid step.
    Produces an output shaped like tiled_arrays[0]."""
    shape = tiled_arrays[0].shape
    C = shape[-1]
    M = math.prod(shape[:-1]) if len(shape) > 1 else 1
    flats = [a.reshape(M, C) for a in tiled_arrays]
    dtype = flats[0].dtype
    itemsize = jnp.dtype(dtype).itemsize

    param_bytes = sum(int(p.size) * jnp.dtype(p.dtype).itemsize
                      for p in whole_arrays)
    tm = _pick_block_rows(M, C, dtype, len(flats), param_bytes, block_rows)
    # Partial tail tile (if any) is masked by Pallas: no pad / slice HBM passes.
    n_tiles = pl.cdiv(M, tm)

    in_specs = [pl.BlockSpec((tm, C), lambda i: (i, 0)) for _ in flats]
    # Parameters (weights/bias) are small: keep them whole and resident.
    in_specs += [
        pl.BlockSpec(p.shape, lambda i, nd=p.ndim: (0,) * nd)
        for p in whole_arrays
    ]

    # Explicit VMEM limit: double-buffered row tiles + resident params + slack.
    vmem_bytes = 2 * (len(flats) + 1) * tm * C * itemsize + 2 * param_bytes
    vmem_limit = int(min(max(vmem_bytes + (2 << 20), 8 << 20), 64 << 20))

    bytes_accessed = (len(flats) + 1) * M * C * itemsize + param_bytes
    cost = pl.CostEstimate(
        flops=int(flops) if flops is not None else M * C,
        transcendentals=0,
        bytes_accessed=int(bytes_accessed),
    )

    out = pl.pallas_call(
        kernel,
        out_shape=jax.ShapeDtypeStruct((M, C), dtype),
        grid_spec=pltpu.PrefetchScalarGridSpec(
            num_scalar_prefetch=0,
            grid=(n_tiles,),
            in_specs=in_specs,
            out_specs=pl.BlockSpec((tm, C), lambda i: (i, 0)),
        ),
        compiler_params=pltpu.CompilerParams(
            dimension_semantics=("parallel",),  # row tiles shard across TCs
            vmem_limit_bytes=vmem_limit,
        ),
        cost_estimate=cost,
        input_output_aliases=input_output_aliases or {},
    )(*flats, *whole_arrays)

    return out.reshape(shape)


def residual_fused(inner_fn, x, *params, block_rows=None, inner_flops=0):
    """out = x + inner_fn(x, *params), with inner_fn fused into the Pallas kernel.

    inner_fn must be applicable independently per (rows, C) tile (pointwise
    ops, per-row ops, a last-dim Linear/MLP, ...).  x is streamed from HBM
    once; the intermediate inner_fn(x) never round-trips through HBM.
    """
    n_params = len(params)

    def kernel(*refs):
        x_ref = refs[0]
        p_refs = refs[1:1 + n_params]
        o_ref = refs[-1]
        xv = x_ref[...]
        fx = inner_fn(xv, *(p[...] for p in p_refs))
        # Residual add in f32; single cast at the store.
        out = xv.astype(jnp.float32) + fx.astype(jnp.float32)
        o_ref[...] = out.astype(o_ref.dtype)

    shape = x.shape
    M = math.prod(shape[:-1]) if len(shape) > 1 else 1
    flops = M * shape[-1] + int(inner_flops)
    return _call_rowwise(kernel, [x], list(params), block_rows, flops=flops)


def residual_add(x, fx, block_rows=None, alias_fx=False):
    """General path: out = x + fx where fx = module(x) was computed in plain JAX.

    # TODO(synk): arbitrary nn.Modules that cannot be applied per row-tile have
    # no clean in-kernel Pallas equivalent; only the residual add is fused here.
    """

    def kernel(x_ref, fx_ref, o_ref):
        o_ref[...] = (x_ref[...].astype(jnp.float32)
                      + fx_ref[...].astype(jnp.float32)).astype(o_ref.dtype)

    shape = x.shape
    M = math.prod(shape[:-1]) if len(shape) > 1 else 1
    # fx's buffer is dead after the add -> it may alias the output.
    aliases = {1: 0} if alias_fx else None
    return _call_rowwise(kernel, [x, fx], [], block_rows,
                         flops=M * shape[-1], input_output_aliases=aliases)


if __name__ == "__main__":
    # Small shapes consistent with Residual over a (batch, seq, channels) stream.
    # C = 128 keeps output stores lane-dense (full 128-lane vregs).
    B, L, C = 2, 16, 128
    key = jax.random.PRNGKey(0)
    kx, kw, kb = jax.random.split(key, 3)
    x = jax.random.normal(kx, (B, L, C), dtype=jnp.float32)
    w = jax.random.normal(kw, (C, C), dtype=jnp.float32) * 0.02
    b = jax.random.normal(kb, (1, C), dtype=jnp.float32) * 0.02

    # References computed up-front.
    ref1 = x + (jnp.dot(x.reshape(-1, C), w).reshape(B, L, C) + b.reshape(1, 1, C))
    fx = jnp.tanh(x)
    ref2 = x + fx

    # --- Fused path: Residual(Linear) -> out = x + (x @ W + b), module fused
    # in-kernel.  MXU operands in bf16 (f32 accumulate); W resident in bf16.
    def linear_tile(xt, w_t, b_t):
        y = jnp.dot(xt.astype(jnp.bfloat16), w_t,
                    preferred_element_type=jnp.float32)
        return y + b_t

    w_bf16 = w.astype(jnp.bfloat16)
    out1 = jax.block_until_ready(
        residual_fused(linear_tile, x, w_bf16, b,
                       block_rows=16,                # 2 even tiles (v7x 2-TC split)
                       inner_flops=2 * B * L * C * C))
    assert out1.shape == ref1.shape, (out1.shape, ref1.shape)
    assert out1.dtype == ref1.dtype, (out1.dtype, ref1.dtype)
    # bf16 MXU operands -> small numeric tolerance.
    assert jnp.allclose(out1, ref1, atol=1e-2, rtol=1e-2), "fused residual mismatch"

    # --- General path: arbitrary module evaluated outside, residual add in Pallas.
    # block_rows=24 -> grid of 2 with a masked partial tail tile (no pad/slice).
    out2 = jax.block_until_ready(residual_add(x, fx, block_rows=24))
    assert out2.shape == ref2.shape and out2.dtype == ref2.dtype
    assert jnp.array_equal(out2, ref2), "residual add mismatch"

    # --- Auto-sized path: block_rows=None derives the tile from the VMEM budget.
    out3 = jax.block_until_ready(residual_add(x, fx))
    assert jnp.array_equal(out3, ref2), "auto-sized residual add mismatch"

    print("KERNEL_OK")
</pallas_src>

<mosaic_0001>
module attributes {stable_mosaic.version = 11 : i64} {
  func.func @kernel(%arg0: i32, %arg1: memref<16x128xf32, #tpu.memory_space<vmem>>, %arg2: memref<128x128xbf16, #tpu.memory_space<vmem>>, %arg3: memref<1x128xf32, #tpu.memory_space<vmem>>, %arg4: memref<16x128xf32, #tpu.memory_space<vmem>>) attributes {dimension_semantics = [#tpu.dimension_semantics<parallel>], iteration_bounds = array<i64: 2>, scalar_prefetch = 0 : i64, scratch_operands = 0 : i64, tpu.core_type = #tpu.core_type<tc>, window_params = [{transform_indices = @transform_0, window_bounds = array<i64: 16, 128>}, {pipeline_mode = #tpu.pipeline_mode<synchronous>, transform_indices = @transform_1, window_bounds = array<i64: 128, 128>}, {pipeline_mode = #tpu.pipeline_mode<synchronous>, transform_indices = @transform_2, window_bounds = array<i64: 1, 128>}, {transform_indices = @transform_3, window_bounds = array<i64: 16, 128>}]} {
    %c0 = arith.constant 0 : index
    %c0_0 = arith.constant 0 : index
    %0 = vector.load %arg1[%c0, %c0_0] : memref<16x128xf32, #tpu.memory_space<vmem>>, vector<16x128xf32>
    %c0_1 = arith.constant 0 : index
    %c0_2 = arith.constant 0 : index
    %1 = vector.load %arg2[%c0_1, %c0_2] : memref<128x128xbf16, #tpu.memory_space<vmem>>, vector<128x128xbf16>
    %c0_3 = arith.constant 0 : index
    %c0_4 = arith.constant 0 : index
    %2 = vector.load %arg3[%c0_3, %c0_4] : memref<1x128xf32, #tpu.memory_space<vmem>>, vector<1x128xf32>
    %3 = arith.truncf %0 : vector<16x128xf32> to vector<16x128xbf16>
    %cst = arith.constant dense<0.000000e+00> : vector<16x128xf32>
    %4 = tpu.matmul %3, %1, %cst {dimension_numbers = #tpu.dot_dimension_numbers<[1], [0], [0], [1], [0, 0, 1, 1], [], []>} : vector<16x128xbf16>, vector<128x128xbf16>, vector<16x128xf32> -> vector<16x128xf32>
    %5 = vector.broadcast %2 : vector<1x128xf32> to vector<16x128xf32>
    %6 = arith.addf %4, %5 : vector<16x128xf32>
    %7 = arith.addf %0, %6 : vector<16x128xf32>
    %c0_5 = arith.constant 0 : index
    %c0_6 = arith.constant 0 : index
    %8 = vector.load %arg4[%c0_5, %c0_6] : memref<16x128xf32, #tpu.memory_space<vmem>>, vector<16x128xf32>
    tpu.vector_store %arg4[%c0_5, %c0_6], %7 {strides = array<i32>} : memref<16x128xf32, #tpu.memory_space<vmem>>, vector<16x128xf32>,
    return
  }
  func.func @transform_0(%arg0: i32) -> (i32, i32) {
    %c0_i32 = arith.constant 0 : i32
    %c0_i32_0 = arith.constant 0 : i32
    return %arg0, %c0_i32 : i32, i32
  }
  func.func @transform_1(%arg0: i32) -> (i32, i32) {
    %c0_i32 = arith.constant 0 : i32
    %c0_i32_0 = arith.constant 0 : i32
    %c0_i32_1 = arith.constant 0 : i32
    return %c0_i32, %c0_i32_0 : i32, i32
  }
  func.func @transform_2(%arg0: i32) -> (i32, i32) {
    %c0_i32 = arith.constant 0 : i32
    %c0_i32_0 = arith.constant 0 : i32
    %c0_i32_1 = arith.constant 0 : i32
    return %c0_i32, %c0_i32_0 : i32, i32
  }
  func.func @transform_3(%arg0: i32) -> (i32, i32) {
    %c0_i32 = arith.constant 0 : i32
    %c0_i32_0 = arith.constant 0 : i32
    return %arg0, %c0_i32 : i32, i32
  }
}

</mosaic_0001>

<bundles_post_ra>
// kernel: tpu_custom_call.1
= control target key start
LH: loop header
LB: loop body
LE: loop exit
PB: predicated region body
PF: predicated region fallthrough
CT: control target
= control target key end

     0   :  { %8 = vsyncpa [#allocation3], 0  ;;  %s925_s0 = inlined_call_operand.hbm [shape: f32[32,128], index: 0, kind: input, shape index: {}]   ;;  %s926_s1 = inlined_call_operand.hbm [shape: bf16[128,128], index: 1, kind: input, shape index: {}]   ;;  %s927_s2 = inlined_call_operand.vmem [shape: f32[1,128], index: 2, kind: input, shape index: {}]   ;;  %s928_s3 = inlined_call_operand.hbm [shape: f32[32,128], index: 3, kind: output, shape index: {}]  }
   0x1   :  { %10 = vsyncpa [#allocation3 + $0x1], 0 }
   0x2   :  { %11 = vsyncpa [#allocation6], 0 }
   0x3   :  { %12 = vsyncpa [#allocation4], 0 }
   0x4   :  { %14 = vsyncpa [#allocation4 + $0x1], 0  ;;  %s713_s12 = smov 0   ;;  %s715_s13 = smov 0  }
   0x5   :  { %s717_s14 = smov 0   ;;  %s719_s15 = smov 0  }
   0x6 LB: > { %s734_s16 = sadd.s32 4294967295, %s680_s15   ;;  %s423_s17 = sadd.s32 4294967294, %s680_s15   ;;  %s680_s15 = sphi %s719_s15, %s948_s15   ;;  %s676_s14 = sphi %s717_s14, %s947_s14   ;;  %s672_s13 = sphi %s715_s13, %s946_s13   ;;  %s668_s12 = sphi %s713_s12, %s945_s12  }
   0x7   : > { %p40_p0 = scmp.ne.s32.totalorder %s672_s13, %s668_s12  ;;  %p929_p1 = scmp.eq.s32.totalorder %s734_s16, 0 }
   0x8   : > { %p112_p3 = scmp.eq.s32.totalorder %s423_s17, 1  ;;  %p424_p5 = scmp.ge.s32.totalorder %s680_s15, 1 }
   0x9   : > { %p743_p4 = por %p929_p1, %p40_p0  ;;  %p119_p7 = scmp.lt.s32.totalorder %s680_s15, 3 }
   0xa   : > { %p748_p6 = por %p112_p3, %p40_p0  ;;  %s682_s21 = smov [#allocation5]  }
   0xb   : > { %s932_s18 = scalar_select %p743_p4, 1, 0 }
   0xc   : > { %s933_s19 = scalar_select %p748_p6, 1, 0 }
   0xd   : > { %p753_p8 = pnand %p424_p5, %p119_p7  ;;  %s131_s22 = sshll.u32 %s682_s21, 4  ;;  %s757_s22 = int_to_ptr.vmem [resolvable:$true] %s131_s22 }
   0xe   : > { %s769_s24 = sadd.s32 1, %s680_s15   ;;  %s27_s25 = sadd.s32 1, %s676_s14 }
   0xf   : > { %s934_s20 = scalar_select %p753_p8, 1, 0 }
  0x10   : > { %p487_p9 = pneg %p753_p8  ;;  %s24_s26 = ssub.s32 %s680_s15, %s769_s24 }
  0x11   : > { %s552_s29 = scalar_lea.hbm %s926_s1, 1024 }
  0x12   : > { %p764_p11 = pnand %p487_p9, %p929_p1  ;;  %p553_p12 = scmp.ne.s32.totalorder %s926_s1, %s552_s29 }
  0x13   : > { %p559_p5 = scmp.lt.u32.totalorder %s552_s29, %s926_s1 }
  0x14   : > { %p554_p13 = pneg %p764_p11 }
  0x16   : > { %p555_p0 = pnand %p554_p13, %p553_p12 }
  0x18   : > { %p556_p3 = pneg %p555_p0 }
  0x1a   : > { %p561_p7 = pnand %p559_p5, %p556_p3 }
  0x1c   : > { %564 = shalt.err (!%p561_p7)
}
  0x1d   : > { %s565_s7 = scalar_lea.vmem %s757_s22, 1024  ;;  %p573_p2 = scmp.lt.s32.totalorder %s757_s22, %s757_s22 }
  0x1e   : > { %p566_p9 = scmp.ne.s32.totalorder %s757_s22, %s565_s7  ;;  %p574_p6 = scmp.lt.s32.totalorder %s565_s7, %s565_s7 }
  0x20   : > { %p568_p10 = pnand %p566_p9, %p554_p13  ;;  %p575_p4 = por %p574_p6, %p573_p2 }
  0x22   : > { %p569_p1 = pneg %p568_p10 }
  0x24   : > { %p576_p8 = pnand %p575_p4, %p569_p1 }
  0x26   : > { %579 = shalt.err (!%p576_p8)
}
  0x27   : > { %s683_s8 = smov 64   ;;  %s684_s9 = smov 4  }
  0x28   : > { %490 = dma.hbm_to_vmem [thread:$0]  (!%p764_p11), %s926_s1, 1024, %s757_s22, [#allocation6], %s683_s8, %s683_s8, %s684_s9  }
  0x29   : > { %p25_p2 = scmp.eq.s32.totalorder %s24_s26, 0  ;;  %p34_p1 = scmp.ne.s32.totalorder %s676_s14, %s672_s13 }
  0x2a   : > { %p35_p4 = scmp.eq.s32.totalorder %s680_s15, 0  ;;  %p500_p6 = scmp.lt.s32.totalorder %s680_s15, 2 }
  0x2b   : > { %s800_s17 = scalar_select %p25_p2, %s676_s14, %s27_s25  }
  0x2c   : > { %p36_p8 = por %p35_p4, %p34_p1  ;;  %p936_p10 = scmp.eq.s32.totalorder %s734_s16, 1 }
  0x2d   : > { %s148_s27 = sand.u32 1, %s676_s14   ;;  %s448_s28 = sshll.u32 %s680_s15, 8 }
  0x2e   : > { %p804_p12 = por %p936_p10, %p34_p1  ;;  %s427_s29 = sshll.u32 %s148_s27, 4 }
  0x2f   : > { %s813_s4 = scalar_lea.hbm %s925_s0, %s448_s28  ;;  %s152_s22 = scalar_lea.vmem [#allocation2], %s427_s29 }
  0x30   : > { %s159_s25 = sshll.u32 %s152_s22, 4  ;;  %p815_p11 = pnand %p500_p6, %p36_p8  ;;  %s819_s25 = int_to_ptr.vmem [resolvable:$true] %s159_s25 }
  0x31   : > { %s821_s5 = scalar_lea.sflag [#allocation3], %s148_s27  ;;  %s580_s6 = scalar_lea.hbm %s813_s4, 256 }
  0x32   : > { %p581_p13 = scmp.ne.s32.totalorder %s813_s4, %s580_s6  ;;  %p582_p0 = pneg %p815_p11 }
  0x33   : > { %s585_s9 = scalar_lea.hbm %s925_s0, 512  ;;  %p586_p7 = scmp.lt.u32.totalorder %s813_s4, %s925_s0 }
  0x34   : > { %p583_p3 = pnand %p582_p0, %p581_p13  ;;  %p587_p9 = scmp.lt.u32.totalorder %s585_s9, %s580_s6 }
  0x35   : > { %p589_p1 = scmp.lt.u32.totalorder %s580_s6, %s813_s4 }
  0x36   : > { %p584_p5 = pneg %p583_p3  ;;  %p588_p2 = por %p587_p9, %p586_p7 }
  0x38   : > { %p590_p4 = por %p589_p1, %p588_p2 }
  0x3a   : > { %p591_p6 = pnand %p590_p4, %p584_p5 }
  0x3c   : > { %594 = shalt.err (!%p591_p6)
}
  0x3d   : > { %s595_s27 = scalar_lea.vmem %s819_s25, 256  ;;  %s685_s28 = smov [#allocation2]  }
  0x3e   : > { %p596_p8 = scmp.ne.s32.totalorder %s819_s25, %s595_s27  ;;  %s600_s29 = sshll.u32 %s685_s28, 4  ;;  %s601_s29 = int_to_ptr.vmem [resolvable:$false] %s600_s29 }
  0x3f   : > { %s602_s23 = scalar_lea.vmem %s601_s29, 512  ;;  %p603_p3 = scmp.lt.s32.totalorder %s819_s25, %s601_s29 }
  0x40   : > { %p598_p10 = pnand %p596_p8, %p582_p0  ;;  %p604_p7 = scmp.lt.s32.totalorder %s602_s23, %s595_s27 }
  0x42   : > { %p599_p13 = pneg %p598_p10  ;;  %p605_p9 = por %p604_p7, %p603_p3 }
  0x44   : > { %p606_p2 = pnand %p605_p9, %p599_p13 }
  0x46   : > { %609 = shalt.err (!%p606_p2)
}
  0x47   : > { %s686_s30 = smov 128   ;;  %s687_s22 = smov 8  }
  0x48   : > { %494 = dma.hbm_to_vmem [thread:$0]  (!%p815_p11), %s813_s4, 256, %s819_s25, %s821_s5, %s686_s30, %s686_s30, %s687_s22  }
  0x49   : > { %p939_p0 = scmp.ne.s32.totalorder %s934_s20, 0 }
  0x4a   : > { %s852_s6 = sand.u32 (!%p939_p0), 1, %s672_s13   ;;  %p940_p5 = scmp.ne.s32.totalorder (!%p939_p0), %s932_s18, 0 }
  0x4b   : > { %171 = sbr.rel (%p939_p0) target bundleno = 352 (0x160), region = 32  ;;  %s431_s7 = sshll.u32 (!%p939_p0), %s852_s6, 4 }
  0x4c   : > { %s174_s8 = scalar_lea.sflag (!%p939_p0), [#allocation3], %s852_s6  ;;  %s858_s9 = scalar_lea.vmem (!%p939_p0), [#allocation2], %s431_s7 }
  0x52   : > { %655 = dma.done.wait (%p940_p5), %s174_s8, 256  }
  0x53   : > { %657 = vsyncadd (%p940_p5), %s174_s8, 4294967040  ;;  %p941_p11 = scmp.eq.s32.totalorder %s734_s16, 0 }
  0x55   : > { %659 = dma.done.wait (%p941_p11), [#allocation6], 1024   ;;  %p942_p1 = pmov %p941_p11 }
  0x56   : > { %v688_v0 = vmov 0.0   ;;  %vm689_vm0 = vmmov 0   ;;  %v544_v1 = vld [vmem:[#allocation5] sm:$0xff]   ;;  %v545_v2 = vld [vmem:[#allocation5 + $0x8] sm:$0xff]   ;;  %v546_v3 = vld [vmem:[#allocation5 + $0x10] sm:$0xff]   ;;  %s203_s4 = scalar_lea.vmem [#allocation7], %s431_s7 }
  0x57   : > { %661 = vsyncadd (%p942_p1), [#allocation6], 4294966272  ;;  %459 = vmatprep.subr.bf16.mxu0 %v688_v0  ;;  %475 = vmatprep.mubr.msk.bf16.mxu0 %vm689_vm0, %v688_v0  ;;  %v547_v4 = vld [vmem:[#allocation5 + $0x18] sm:$0xff]   ;;  %v548_v5 = vld [vmem:[#allocation5 + $0x20] sm:$0xff]   ;;  %s340_s25 = sshll.u32 %s203_s4, 4  ;;  %s449_s26 = sshll.u32 %s734_s16, 8  ;;  %s876_s25 = int_to_ptr.vmem [resolvable:$true] %s340_s25 }
  0x58   : > { %460 = vmatpush3.bf16.msra.mxu0 %v544_v1  ;;  %v549_v6 = vld [vmem:[#allocation5 + $0x28] sm:$0xff]   ;;  %v550_v7 = vld [vmem:[#allocation5 + $0x30] sm:$0xff]   ;;  %v551_v8 = vld [vmem:[#allocation5 + $0x38] sm:$0xff]   ;;  %s881_s11 = scalar_lea.hbm %s928_s3, %s449_s26  ;;  %s327_s27 = scalar_lea.sflag [#allocation4], %s852_s6 }
  0x59   : > { %461 = vmatprep.subr.bf16.mxu0 %v688_v0  ;;  %v207_v9 = vld [vmem:[%s858_s9] sm:$0xff]  ;;  %v208_v10 = vld [vmem:[%s858_s9 + $0x8] sm:$0xff]  ;;  %s610_s28 = scalar_lea.vmem %s876_s25, 256  ;;  %s690_s16 = smov [#allocation7]  }
  0x5a   : > { %v226_v11 = vpack.c.bf16 %v208_v10, %v207_v9  ;;  %v434_v12 = vld [vmem:[%s927_s2] ss:$0 sm:$0xff]  ;;  %p611_p4 = scmp.ne.s32.totalorder %s876_s25, %s610_s28  ;;  %s614_s29 = sshll.u32 %s690_s16, 4  ;;  %s615_s29 = int_to_ptr.vmem [resolvable:$false] %s614_s29 }
  0x5b   : > { %s616_s23 = scalar_lea.vmem %s615_s29, 512  ;;  %p617_p10 = scmp.lt.s32.totalorder %s876_s25, %s615_s29 }
  0x5c   : > { %462 = vmatpush3.bf16.msra.mxu0 %v545_v2  ;;  %p612_p6 = pnand %p611_p4, %p804_p12  ;;  %p618_p13 = scmp.lt.s32.totalorder %s616_s23, %s610_s28 }
  0x5d   : > { %463 = vmatprep.subr.bf16.mxu0 %v688_v0 }
  0x5e   : > { %p613_p8 = pneg %p612_p6  ;;  %p619_p3 = por %p618_p13, %p617_p10 }
  0x60   : > { %464 = vmatpush3.bf16.msra.mxu0 %v546_v3  ;;  %p620_p7 = pnand %p619_p3, %p613_p8 }
  0x61   : > { %465 = vmatprep.subr.bf16.mxu0 %v688_v0 }
  0x64   : > { %466 = vmatpush3.bf16.msra.mxu0 %v547_v4 }
  0x65   : > { %467 = vmatprep.subr.bf16.mxu0 %v688_v0 }
  0x68   : > { %468 = vmatpush3.bf16.msra.mxu0 %v548_v5 }
  0x69   : > { %469 = vmatprep.subr.bf16.mxu0 %v688_v0 }
  0x6c   : > { %470 = vmatpush3.bf16.msra.mxu0 %v549_v6 }
  0x6d   : > { %471 = vmatprep.subr.bf16.mxu0 %v688_v0 }
  0x70   : > { %472 = vmatpush3.bf16.msra.mxu0 %v550_v7 }
  0x71   : > { %473 = vmatprep.subr.bf16.mxu0 %v688_v0 }
  0x74   : > { %474 = vmatpush3.bf16.msra.mxu0 %v551_v8 }
  0x77   : > { %476 = vmatmul.mubr.bf16.vlgmr.msra.gmra.mrb[0].mxu0 %v226_v11 }
 0x14a   : > { %v315_v13 = vpop.f32.mrb[0].mxu0 }
 0x14b   : > { %v316_v14 = vadd.f32 %v434_v12, %v315_v13  ;;  %v477_v15 = vpop.f32.mrb[1].mxu0 }
 0x14c   : > { %v318_v16 = vpop.f32.mrb[2].mxu0 }
 0x14d   : > { %v322_v17 = vadd.f32 %v316_v14, %v207_v9  ;;  %v319_v18 = vadd.f32 %v434_v12, %v318_v16  ;;  %v478_v19 = vpop.f32.mrb[3].mxu0 }
 0x14f   : > { %324 = vst [vmem:[%s203_s4] sm:$0xff] %v322_v17  ;;  %v323_v20 = vadd.f32 %v319_v18, %v208_v10 }
 0x151   : > { %325 = vst [vmem:[%s203_s4 + $0x8] sm:$0xff] %v323_v20 }
 0x152   : > { %623 = shalt.err (!%p620_p7)
}
 0x153   : > { %s624_s30 = scalar_lea.hbm %s881_s11, 256  ;;  %s628_s8 = scalar_lea.hbm %s928_s3, 512 }
 0x154   : > { %p625_p9 = scmp.ne.s32.totalorder %s881_s11, %s624_s30  ;;  %p629_p5 = scmp.lt.u32.totalorder %s881_s11, %s928_s3 }
 0x155   : > { %p630_p11 = scmp.lt.u32.totalorder %s628_s8, %s624_s30  ;;  %p632_p4 = scmp.lt.u32.totalorder %s624_s30, %s881_s11 }
 0x156   : > { %p626_p2 = pnand %p625_p9, %p804_p12 }
 0x157   : > { %p631_p1 = por %p630_p11, %p629_p5 }
 0x158   : > { %p627_p0 = pneg %p626_p2 }
 0x159   : > { %p633_p6 = por %p632_p4, %p631_p1 }
 0x15b   : > { %p634_p8 = pnand %p633_p6, %p627_p0 }
 0x15d   : > { %637 = shalt.err (!%p634_p8)
}
 0x15e   : > { %s691_s20 = smov 128   ;;  %s692_s4 = smov 8  }
 0x15f   : > { %485 = dma.vmem_to_hbm [thread:$0]  (%p804_p12), %s876_s25, 256, %s881_s11, %s327_s27, %s691_s20, %s691_s20, %s692_s4  }
 0x160 PF: > { %s355_s26 = sand.u32 1, %s668_s12   ;;  %p943_p10 = scmp.ne.s32.totalorder %s933_s19, 0 }
 0x161   : > { %p944_p13 = scmp.ge.s32.totalorder %s680_s15, 2  ;;  %s356_s5 = scalar_lea.sflag [#allocation4], %s355_s26 }
 0x163   : > { %p496_p3 = pnand %p944_p13, %p943_p10 }
 0x165   : > { %663 = dma.done.wait (!%p496_p3), %s356_s5, 256  }
 0x166   : > { %665 = vsyncadd (!%p496_p3), %s356_s5, 4294967040  ;;  %p17_p7 = scmp.ge.s32.totalorder %s769_s24, 4   ;;  %s945_s12 = smov %s672_s13 }
 0x167   : > { %s946_s13 = smov %s676_s14  ;;  %s947_s14 = smov %s800_s17 }
 0x168   : > { %s948_s15 = smov %s769_s24  ;;  %19 = sbr.rel (!%p17_p7) target bundleno = 6 (0x6), region = 81 }
 0x16f   :  { %361 = vsyncpa [#allocation3], 1 }
 0x170   :  { %363 = vsyncpa [#allocation3 + $0x1], 1 }
 0x171   :  { %364 = vsyncpa [#allocation6], 1 }
 0x172   :  { %365 = vsyncpa [#allocation4], 1 }
 0x173   :  { %367 = vsyncpa [#allocation4 + $0x1], 1 }

</bundles_post_ra>
